<compile_context>
chip_gen: v5e
topology: v5e:2x2
jax: 0.10.0
libtpu: 0.0.40
codegen_flags: <defaults>
</compile_context>

<pallas_src>
import jax
import jax.numpy as jnp
from jax.experimental import pallas as pl
from jax.experimental.pallas import tpu as pltpu

_CHUNK_THRESHOLD_BYTES = 1 * 1024 * 1024   # chunk the DMA for arrays >= 1 MiB
_MAX_CHUNKS = 4                            # 2-4 chunks is enough to use the DMA engines


def identity(x: jax.Array) -> jax.Array:
    """Identity forward pass. Zero-cost: no kernel, no data movement."""
    return x


def _whole_copy_kernel(x_hbm, o_hbm, sems):
    # Single HBM->HBM DMA of the full array (no VMEM bounce, no grid).
    cp = pltpu.make_async_copy(x_hbm, o_hbm, sems.at[0])
    cp.start()
    cp.wait()


def _make_chunked_copy_kernel(starts, sizes):
    """HBM->HBM copy split into static chunks along the leading axis."""
    nchunks = len(sizes)

    def kernel(x_hbm, o_hbm, sems):
        copies = [
            pltpu.make_async_copy(
                x_hbm.at[pl.ds(starts[c], sizes[c])],
                o_hbm.at[pl.ds(starts[c], sizes[c])],
                sems.at[c],
            )
            for c in range(nchunks)
        ]
        for cp in copies:   # issue all DMAs first ...
            cp.start()
        for cp in copies:   # ... then wait, so they run concurrently
            cp.wait()

    return kernel


def identity_pallas(x: jax.Array, *, donate: bool = False) -> jax.Array:
    """Identity as a Pallas kernel: direct HBM->HBM DMA copy.

    Set donate=True only when the caller actually donates x (e.g. via
    jit(..., donate_argnums=...)); otherwise XLA inserts a defensive copy.
    """
    if x.size == 0:
        return x

    itemsize = jnp.dtype(x.dtype).itemsize
    nbytes = int(x.size) * itemsize

    leading = x.shape[0] if x.ndim >= 1 else 1
    if x.ndim >= 1 and leading >= 2 and nbytes >= _CHUNK_THRESHOLD_BYTES:
        nchunks = min(_MAX_CHUNKS, leading)
        base, rem = divmod(leading, nchunks)
        sizes = [base + (1 if c < rem else 0) for c in range(nchunks)]
        starts = [sum(sizes[:c]) for c in range(nchunks)]
        kernel = _make_chunked_copy_kernel(starts, sizes)
        sem_scratch = pltpu.SemaphoreType.DMA((nchunks,))
    else:
        kernel = _whole_copy_kernel
        sem_scratch = pltpu.SemaphoreType.DMA((1,))

    return pl.pallas_call(
        kernel,
        out_shape=jax.ShapeDtypeStruct(x.shape, x.dtype),
        in_specs=[pl.BlockSpec(memory_space=pl.ANY)],     # stay in HBM: no VMEM bounce
        out_specs=pl.BlockSpec(memory_space=pl.ANY),
        scratch_shapes=[sem_scratch],
        input_output_aliases=({0: 0} if donate else {}),
        cost_estimate=pl.CostEstimate(
            flops=0, transcendentals=0, bytes_accessed=2 * nbytes),
    )(x)


if __name__ == "__main__":
    key = jax.random.PRNGKey(0)
    key, key_big = jax.random.split(key)

    # Shape consistent with an NCHW feature map: batch=2, channels=4, 16x16.
    x = jax.random.normal(key, (2, 4, 16, 16), dtype=jnp.float32)

    # Preferred (true) identity path: free, returns the input as-is.
    y_fast = identity(x)
    assert y_fast is x, "identity() should return the input unchanged"

    # Pallas DMA-copy path (small input -> single whole-array DMA).
    y = identity_pallas(x)
    jax.block_until_ready(y)
    assert y.shape == x.shape, f"shape mismatch: {y.shape} vs {x.shape}"
    assert y.dtype == x.dtype, f"dtype mismatch: {y.dtype} vs {x.dtype}"
    assert bool(jnp.all(y == x)), "identity output differs from input"

    # Larger input to exercise the multi-chunk DMA path (2 MiB -> 4 chunks).
    x_big = jax.random.normal(key_big, (512, 1024), dtype=jnp.float32)
    y_big = identity_pallas(x_big)
    jax.block_until_ready(y_big)
    assert y_big.shape == x_big.shape and y_big.dtype == x_big.dtype
    assert bool(jnp.all(y_big == x_big)), "chunked identity output differs from input"

    print("KERNEL_OK")
</pallas_src>

<mosaic_0001>
module attributes {stable_mosaic.version = 11 : i64} {
  func.func @_whole_copy_kernel(%arg0: memref<2x4x16x16xf32, #tpu.memory_space<any>>, %arg1: memref<2x4x16x16xf32, #tpu.memory_space<any>>, %arg2: memref<1x!tpu.dma_semaphore, #tpu.memory_space<semaphore_mem>>) attributes {dimension_semantics = [], scalar_prefetch = 0 : i64, scratch_operands = 1 : i64, tpu.core_type = #tpu.core_type<tc>} {
    %c0_i32 = arith.constant 0 : i32
    %0 = tpu.memref_slice %arg2[%c0_i32] : memref<1x!tpu.dma_semaphore, #tpu.memory_space<semaphore_mem>> -> memref<1x!tpu.dma_semaphore, #tpu.memory_space<semaphore_mem>>
    %1 = tpu.memref_squeeze %0 : memref<1x!tpu.dma_semaphore, #tpu.memory_space<semaphore_mem>> -> memref<!tpu.dma_semaphore, #tpu.memory_space<semaphore_mem>>
    tpu.enqueue_dma source(%arg0 : memref<2x4x16x16xf32, #tpu.memory_space<any>>) target(%arg1 : memref<2x4x16x16xf32, #tpu.memory_space<any>>) target_semaphore(%1 : memref<!tpu.dma_semaphore, #tpu.memory_space<semaphore_mem>>)
    %c0_i32_0 = arith.constant 0 : i32
    %2 = tpu.memref_slice %arg2[%c0_i32_0] : memref<1x!tpu.dma_semaphore, #tpu.memory_space<semaphore_mem>> -> memref<1x!tpu.dma_semaphore, #tpu.memory_space<semaphore_mem>>
    %3 = tpu.memref_squeeze %2 : memref<1x!tpu.dma_semaphore, #tpu.memory_space<semaphore_mem>> -> memref<!tpu.dma_semaphore, #tpu.memory_space<semaphore_mem>>
    tpu.wait_dma2 semaphore(%3 : memref<!tpu.dma_semaphore, #tpu.memory_space<semaphore_mem>>) src(%arg0 : memref<2x4x16x16xf32, #tpu.memory_space<any>>) dst(%arg1 : memref<2x4x16x16xf32, #tpu.memory_space<any>>)
    return
  }
}

</mosaic_0001>

<bundles_post_ra>
// kernel: tpu_custom_call.1
= control target key start
LH: loop header
LB: loop body
LE: loop exit
PB: predicated region body
PF: predicated region fallthrough
CT: control target
= control target key end

     0   :  { %s34_s12 = smov [#allocation2]   ;;  %s35_s13 = smov [#allocation3]   ;;  %s53_s0 = inlined_call_operand.hbm [shape: f32[2,4,16,16], index: 0, kind: input, shape index: {}]   ;;  %s54_s1 = inlined_call_operand.hbm [shape: f32[2,4,16,16], index: 1, kind: output, shape index: {}]  }
   0x1   :  { %s10_s8 = sshll.u32 %s53_s0, 4  ;;  %s12_s11 = sshll.u32 %s54_s1, 4  ;;  %s11_s8 = int_to_ptr.hbm [resolvable:$true] %s10_s8  ;;  %s13_s11 = int_to_ptr.hbm [resolvable:$true] %s12_s11 }
   0x2   :  { %s36_s14 = smov 0  }
   0x3   :  { %16 = dma.general %s11_s8, 2048, %s13_s11, %s34_s12, %s35_s13, [#allocation4], %s36_s14, 0  }
   0x4   :  { %32 = dma.done.wait [#allocation2], 2048 }
   0x5   :  { %33 = vsyncadd [#allocation2], 4294965248 }
   0x6   :  { %22 = vsyncmov [#allocation2] }
   0x9   :  { %s23_s15 = vpop.sfrf %22 }
   0xa   :  { %p28_p0 = scmp.ne.s32.totalorder %s23_s15, 0 }
   0xc   :  { %27 = shalt.err (%p28_p0)  }

</bundles_post_ra>
